<compile_context>
chip_gen: v7x
topology: tpu7x:2x2x1
jax: 0.10.0
libtpu: 0.0.40
codegen_flags: <defaults>
</compile_context>

<pallas_src>
import functools

import numpy as np
import jax
import jax.numpy as jnp
from jax.experimental import pallas as pl
from jax.experimental.pallas import tpu as pltpu


def _dwt3_kernel(x_ref, m_ref, o_ref, *, dt, hh, w, kc, compute_dtype,
                 out_dtype, precision):
    """One (b, c, depth-tile) block.

    x_ref : (1, 1, dt, 2, hh, 2*w)  dims = (b, c, out-depth, depth-parity,
                                            out-h, (h-parity, w))  [free view]
    m_ref : (kc, kc)                fused [w-sum | w-diff] Haar weights (x0.5)
    o_ref : (1, 8, 1, dt, hh, w//2) band-major output block
    """
    nc = kc // 2
    m = m_ref[...]
    dot = functools.partial(jnp.dot, preferred_element_type=jnp.float32,
                            precision=precision)

    for a in range(2):                      # input-depth parity -> L*/H* bands
        for c in range(w // kc):            # W chunk (block-diagonal Haar)
            lo = c * kc
            # h-even / h-odd lanes of this chunk; static ref slices.
            ze = x_ref[0, 0, :, a, :, lo:lo + kc].reshape(dt * hh, kc)
            zo = x_ref[0, 0, :, a, :, w + lo:w + lo + kc].reshape(dt * hh, kc)
            if ze.dtype != jnp.dtype(compute_dtype):
                ze = ze.astype(compute_dtype)
                zo = zo.astype(compute_dtype)

            re_ = dot(ze, m)                # (dt*hh, kc) = [w-sum | w-diff]
            ro_ = dot(zo, m)

            s = re_ + ro_                   # h-sum  : [band 4a+0 | band 4a+1]
            d = ro_ - re_                   # h-diff : [band 4a+2 | band 4a+3]

            olo = c * nc
            for q, v in ((0, s[:, :nc]), (1, s[:, nc:]),
                         (2, d[:, :nc]), (3, d[:, nc:])):
                o_ref[0, 4 * a + q, 0, :, :, olo:olo + nc] = (
                    v.reshape(dt, hh, nc).astype(out_dtype))


def _device_kind():
    try:
        return jax.devices()[0].device_kind.lower()
    except Exception:
        return ""


def _pick_w_chunk(w, compute_dtype, kind):
    """Chunk width for the W-direction Haar matmul.

    bf16 inputs (single MXU pass) and v6e (largest flop/byte budget) can afford
    256-wide chunks, which also makes every band slice 128 lanes (dense stores);
    v5e/v7x f32 stays at 128 so the emulated-f32 MXU work is well below the HBM
    roofline.  Tiny widths fall back to a single full-width chunk.
    """
    if compute_dtype == jnp.bfloat16 or "v6" in kind:
        order = (256, 128)
    else:
        order = (128, 256)
    for kc in order:
        if w % kc == 0:
            return kc
    return w


def _pick_depth_tile(dh, hh, w, itemsize, sublane, budget_bytes):
    """Output-depth slices per grid step (divisor of dh).

    One input block (== one output block) is 4*dt*hh*w*itemsize bytes.  If Hh
    is not a multiple of the sublane tile, force Dt=1 so all in-kernel reshapes
    are trivial (add/drop a size-1 leading dim).
    """
    if hh % sublane != 0:
        return 1
    best = 1
    for d in range(1, dh + 1):
        if dh % d == 0 and 4 * d * hh * w * itemsize <= budget_bytes:
            best = d
    return best


def dwt3(x):
    """Pallas implementation of dwt3_init. x: (B, C, D, H, W), even D/H/W."""
    B, C, D, H, W = x.shape
    assert D % 2 == 0 and H % 2 == 0 and W % 2 == 0, "D, H, W must be even"
    Dh, Hh, Wh = D // 2, H // 2, W // 2

    kind = _device_kind()

    if x.dtype == jnp.bfloat16:
        compute_dtype = jnp.bfloat16
        precision = None               # single-pass bf16 MXU, exact for bf16 data
    else:
        compute_dtype = jnp.float32
        # Mosaic's contract precision is only bf16 (DEFAULT) or fp32 (HIGHEST);
        # DEFAULT would round the data to bf16, so keep HIGHEST and bound the
        # MXU work via the chunk width instead.
        precision = jax.lax.Precision.HIGHEST

    Kc = _pick_w_chunk(W, compute_dtype, kind)
    Nc = Kc // 2

    itemsize = jnp.dtype(x.dtype).itemsize
    sublane = {4: 8, 2: 16, 1: 32}.get(itemsize, 8)
    block_budget = (2 << 20) if "v5" in kind else (4 << 20)
    Dt = _pick_depth_tile(Dh, Hh, W, itemsize, sublane, block_budget)
    grid = (B, C, Dh // Dt)

    # Constant fused Haar matrix [w-sum | w-diff] with the /2 of dwt3 folded in.
    # The block-diagonal pattern is identical for every chunk, so one (Kc, Kc)
    # matrix serves all chunks; passed with a constant index_map -> DMA'd once.
    ii = np.arange(Kc)[:, None]
    jj = np.arange(Nc)[None, :]
    hit = (ii // 2) == jj
    m_sum = np.where(hit, 0.5, 0.0)
    m_dif = np.where(hit, np.where(ii % 2 == 1, 0.5, -0.5), 0.0)
    m_both = jnp.asarray(np.concatenate([m_sum, m_dif], axis=1),
                         dtype=compute_dtype)

    # Free (contiguous) view: split depth into (Dh, parity), fold the h parity
    # into the lane dim.  No HBM traffic for this reshape.
    xv = x.reshape(B, C, Dh, 2, Hh, 2 * W)

    kernel = functools.partial(
        _dwt3_kernel, dt=Dt, hh=Hh, w=W, kc=Kc,
        compute_dtype=compute_dtype, out_dtype=x.dtype, precision=precision)

    out = pl.pallas_call(
        kernel,
        out_shape=jax.ShapeDtypeStruct((B, 8, C, Dh, Hh, Wh), x.dtype),
        grid_spec=pltpu.PrefetchScalarGridSpec(
            num_scalar_prefetch=0,
            grid=grid,
            in_specs=[
                pl.BlockSpec((1, 1, Dt, 2, Hh, 2 * W),
                             lambda b, c, t: (b, c, t, 0, 0, 0)),
                pl.BlockSpec((Kc, Kc), lambda b, c, t: (0, 0)),
            ],
            out_specs=pl.BlockSpec((1, 8, 1, Dt, Hh, Wh),
                                   lambda b, c, t: (b, 0, c, t, 0, 0)),
        ),
        compiler_params=pltpu.CompilerParams(
            dimension_semantics=("parallel", "parallel", "parallel"),
            vmem_limit_bytes=48 * 1024 * 1024,
        ),
    )(xv, m_both)

    # Free reshape: (B, 8, C, Dh, Hh, Wh) -> (B, 8*C, Dh, Hh, Wh).
    return out.reshape(B, 8 * C, Dh, Hh, Wh)


def dwt3_ref(x):
    """Pure-JAX reference mirroring the PyTorch dwt3_init semantics."""
    x00 = x[:, :, 0::2, 0::2, :] / 2
    x01 = x[:, :, 0::2, 1::2, :] / 2
    x10 = x[:, :, 1::2, 0::2, :] / 2
    x11 = x[:, :, 1::2, 1::2, :] / 2
    x000 = x00[:, :, :, :, 0::2]
    x010 = x01[:, :, :, :, 0::2]
    x001 = x00[:, :, :, :, 1::2]
    x011 = x01[:, :, :, :, 1::2]
    x100 = x10[:, :, :, :, 0::2]
    x110 = x11[:, :, :, :, 0::2]
    x101 = x10[:, :, :, :, 1::2]
    x111 = x11[:, :, :, :, 1::2]
    x_LLL = x000 + x010 + x001 + x011
    x_LHL = -x000 - x010 + x001 + x011
    x_LLH = -x000 + x010 - x001 + x011
    x_LHH = x000 - x010 - x001 + x011
    x_HLL = x100 + x110 + x101 + x111
    x_HHL = -x100 - x110 + x101 + x111
    x_HLH = -x100 + x110 - x101 + x111
    x_HHH = x100 - x110 - x101 + x111
    return jnp.concatenate(
        (x_LLL, x_LHL, x_LLH, x_LHH, x_HLL, x_HHL, x_HLH, x_HHH), axis=1
    )


if __name__ == "__main__":
    key = jax.random.PRNGKey(0)

    # Main test: Hh multiple of the sublane tile -> multi-depth tile, free
    # in-kernel reshapes (the "real" path).
    x = jax.random.normal(key, (2, 4, 8, 16, 16), dtype=jnp.float32)
    out = jax.block_until_ready(dwt3(x))
    ref = jax.block_until_ready(dwt3_ref(x))
    assert out.shape == (2, 32, 4, 8, 8), out.shape
    assert jnp.allclose(out, ref, atol=1e-4, rtol=1e-4), "mismatch vs reference"

    # Tiny odd-Hh shape exercises the Dt=1 fallback path.
    x2 = jax.random.normal(jax.random.PRNGKey(1), (2, 4, 8, 8, 8),
                           dtype=jnp.float32)
    out2 = jax.block_until_ready(dwt3(x2))
    ref2 = dwt3_ref(x2)
    assert out2.shape == (2, 32, 4, 4, 4), out2.shape
    assert jnp.allclose(out2, ref2, atol=1e-4, rtol=1e-4), "mismatch (small)"

    print("KERNEL_OK")
</pallas_src>

<mosaic_0001>
module attributes {stable_mosaic.version = 11 : i64} {
  func.func @_dwt3_kernel(%arg0: i32, %arg1: i32, %arg2: i32, %arg3: memref<1x1x4x2x8x32xf32, #tpu.memory_space<vmem>>, %arg4: memref<16x16xf32, #tpu.memory_space<vmem>>, %arg5: memref<1x8x1x4x8x8xf32, #tpu.memory_space<vmem>>) attributes {dimension_semantics = [#tpu.dimension_semantics<parallel>, #tpu.dimension_semantics<parallel>, #tpu.dimension_semantics<parallel>], iteration_bounds = array<i64: 2, 4, 1>, scalar_prefetch = 0 : i64, scratch_operands = 0 : i64, tpu.core_type = #tpu.core_type<tc>, window_params = [{transform_indices = @transform_0, window_bounds = array<i64: 1, 1, 4, 2, 8, 32>}, {pipeline_mode = #tpu.pipeline_mode<synchronous>, transform_indices = @transform_1, window_bounds = array<i64: 16, 16>}, {transform_indices = @transform_2, window_bounds = array<i64: 1, 8, 1, 4, 8, 8>}]} {
    %c0 = arith.constant 0 : index
    %c0_0 = arith.constant 0 : index
    %0 = vector.load %arg4[%c0, %c0_0] : memref<16x16xf32, #tpu.memory_space<vmem>>, vector<16x16xf32>
    %c0_1 = arith.constant 0 : index
    %c0_2 = arith.constant 0 : index
    %c0_3 = arith.constant 0 : index
    %c0_4 = arith.constant 0 : index
    %c0_5 = arith.constant 0 : index
    %c0_6 = arith.constant 0 : index
    %1 = vector.load %arg3[%c0_1, %c0_2, %c0_3, %c0_4, %c0_5, %c0_6] : memref<1x1x4x2x8x32xf32, #tpu.memory_space<vmem>>, vector<1x1x4x1x8x16xf32>
    %2 = vector.shape_cast %1 : vector<1x1x4x1x8x16xf32> to vector<4x8x16xf32>
    %3 = vector.shape_cast %2 : vector<4x8x16xf32> to vector<32x16xf32>
    %c0_7 = arith.constant 0 : index
    %c0_8 = arith.constant 0 : index
    %c0_9 = arith.constant 0 : index
    %c0_10 = arith.constant 0 : index
    %c0_11 = arith.constant 0 : index
    %c16 = arith.constant 16 : index
    %4 = vector.load %arg3[%c0_7, %c0_8, %c0_9, %c0_10, %c0_11, %c16] : memref<1x1x4x2x8x32xf32, #tpu.memory_space<vmem>>, vector<1x1x4x1x8x16xf32>
    %5 = vector.shape_cast %4 : vector<1x1x4x1x8x16xf32> to vector<4x8x16xf32>
    %6 = vector.shape_cast %5 : vector<4x8x16xf32> to vector<32x16xf32>
    %cst = arith.constant dense<0.000000e+00> : vector<32x16xf32>
    %7 = tpu.matmul %3, %0, %cst {dimension_numbers = #tpu.dot_dimension_numbers<[1], [0], [0], [1], [0, 0, 1, 1], [], []>, precision = #tpu.contract_precision<fp32>} : vector<32x16xf32>, vector<16x16xf32>, vector<32x16xf32> -> vector<32x16xf32>
    %cst_12 = arith.constant dense<0.000000e+00> : vector<32x16xf32>
    %8 = tpu.matmul %6, %0, %cst_12 {dimension_numbers = #tpu.dot_dimension_numbers<[1], [0], [0], [1], [0, 0, 1, 1], [], []>, precision = #tpu.contract_precision<fp32>} : vector<32x16xf32>, vector<16x16xf32>, vector<32x16xf32> -> vector<32x16xf32>
    %9 = arith.addf %7, %8 : vector<32x16xf32>
    %10 = arith.subf %8, %7 : vector<32x16xf32>
    %11 = vector.extract_strided_slice %9 {offsets = [0, 0], sizes = [32, 8], strides = [1, 1]} : vector<32x16xf32> to vector<32x8xf32>
    %12 = vector.extract_strided_slice %9 {offsets = [0, 8], sizes = [32, 8], strides = [1, 1]} : vector<32x16xf32> to vector<32x8xf32>
    %13 = vector.extract_strided_slice %10 {offsets = [0, 0], sizes = [32, 8], strides = [1, 1]} : vector<32x16xf32> to vector<32x8xf32>
    %14 = vector.extract_strided_slice %10 {offsets = [0, 8], sizes = [32, 8], strides = [1, 1]} : vector<32x16xf32> to vector<32x8xf32>
    %15 = vector.shape_cast %11 : vector<32x8xf32> to vector<4x8x8xf32>
    %c0_13 = arith.constant 0 : index
    %c0_14 = arith.constant 0 : index
    %c0_15 = arith.constant 0 : index
    %c0_16 = arith.constant 0 : index
    %c0_17 = arith.constant 0 : index
    %c0_18 = arith.constant 0 : index
    %16 = vector.load %arg5[%c0_13, %c0_14, %c0_15, %c0_16, %c0_17, %c0_18] : memref<1x8x1x4x8x8xf32, #tpu.memory_space<vmem>>, vector<1x1x1x4x8x8xf32>
    %17 = vector.shape_cast %16 : vector<1x1x1x4x8x8xf32> to vector<4x8x8xf32>
    %18 = vector.shape_cast %15 : vector<4x8x8xf32> to vector<1x1x1x4x8x8xf32>
    tpu.vector_store %arg5[%c0_13, %c0_14, %c0_15, %c0_16, %c0_17, %c0_18], %18 {strides = array<i32>} : memref<1x8x1x4x8x8xf32, #tpu.memory_space<vmem>>, vector<1x1x1x4x8x8xf32>,
    %19 = vector.shape_cast %12 : vector<32x8xf32> to vector<4x8x8xf32>
    %c0_19 = arith.constant 0 : index
    %c1 = arith.constant 1 : index
    %c0_20 = arith.constant 0 : index
    %c0_21 = arith.constant 0 : index
    %c0_22 = arith.constant 0 : index
    %c0_23 = arith.constant 0 : index
    %20 = vector.load %arg5[%c0_19, %c1, %c0_20, %c0_21, %c0_22, %c0_23] : memref<1x8x1x4x8x8xf32, #tpu.memory_space<vmem>>, vector<1x1x1x4x8x8xf32>
    %21 = vector.shape_cast %20 : vector<1x1x1x4x8x8xf32> to vector<4x8x8xf32>
    %22 = vector.shape_cast %19 : vector<4x8x8xf32> to vector<1x1x1x4x8x8xf32>
    tpu.vector_store %arg5[%c0_19, %c1, %c0_20, %c0_21, %c0_22, %c0_23], %22 {strides = array<i32>} : memref<1x8x1x4x8x8xf32, #tpu.memory_space<vmem>>, vector<1x1x1x4x8x8xf32>,
    %23 = vector.shape_cast %13 : vector<32x8xf32> to vector<4x8x8xf32>
    %c0_24 = arith.constant 0 : index
    %c2 = arith.constant 2 : index
    %c0_25 = arith.constant 0 : index
    %c0_26 = arith.constant 0 : index
    %c0_27 = arith.constant 0 : index
    %c0_28 = arith.constant 0 : index
    %24 = vector.load %arg5[%c0_24, %c2, %c0_25, %c0_26, %c0_27, %c0_28] : memref<1x8x1x4x8x8xf32, #tpu.memory_space<vmem>>, vector<1x1x1x4x8x8xf32>
    %25 = vector.shape_cast %24 : vector<1x1x1x4x8x8xf32> to vector<4x8x8xf32>
    %26 = vector.shape_cast %23 : vector<4x8x8xf32> to vector<1x1x1x4x8x8xf32>
    tpu.vector_store %arg5[%c0_24, %c2, %c0_25, %c0_26, %c0_27, %c0_28], %26 {strides = array<i32>} : memref<1x8x1x4x8x8xf32, #tpu.memory_space<vmem>>, vector<1x1x1x4x8x8xf32>,
    %27 = vector.shape_cast %14 : vector<32x8xf32> to vector<4x8x8xf32>
    %c0_29 = arith.constant 0 : index
    %c3 = arith.constant 3 : index
    %c0_30 = arith.constant 0 : index
    %c0_31 = arith.constant 0 : index
    %c0_32 = arith.constant 0 : index
    %c0_33 = arith.constant 0 : index
    %28 = vector.load %arg5[%c0_29, %c3, %c0_30, %c0_31, %c0_32, %c0_33] : memref<1x8x1x4x8x8xf32, #tpu.memory_space<vmem>>, vector<1x1x1x4x8x8xf32>
    %29 = vector.shape_cast %28 : vector<1x1x1x4x8x8xf32> to vector<4x8x8xf32>
    %30 = vector.shape_cast %27 : vector<4x8x8xf32> to vector<1x1x1x4x8x8xf32>
    tpu.vector_store %arg5[%c0_29, %c3, %c0_30, %c0_31, %c0_32, %c0_33], %30 {strides = array<i32>} : memref<1x8x1x4x8x8xf32, #tpu.memory_space<vmem>>, vector<1x1x1x4x8x8xf32>,
    %c0_34 = arith.constant 0 : index
    %c0_35 = arith.constant 0 : index
    %c0_36 = arith.constant 0 : index
    %c1_37 = arith.constant 1 : index
    %c0_38 = arith.constant 0 : index
    %c0_39 = arith.constant 0 : index
    %31 = vector.load %arg3[%c0_34, %c0_35, %c0_36, %c1_37, %c0_38, %c0_39] : memref<1x1x4x2x8x32xf32, #tpu.memory_space<vmem>>, vector<1x1x4x1x8x16xf32>
    %32 = vector.shape_cast %31 : vector<1x1x4x1x8x16xf32> to vector<4x8x16xf32>
    %33 = vector.shape_cast %32 : vector<4x8x16xf32> to vector<32x16xf32>
    %c0_40 = arith.constant 0 : index
    %c0_41 = arith.constant 0 : index
    %c0_42 = arith.constant 0 : index
    %c1_43 = arith.constant 1 : index
    %c0_44 = arith.constant 0 : index
    %c16_45 = arith.constant 16 : index
    %34 = vector.load %arg3[%c0_40, %c0_41, %c0_42, %c1_43, %c0_44, %c16_45] : memref<1x1x4x2x8x32xf32, #tpu.memory_space<vmem>>, vector<1x1x4x1x8x16xf32>
    %35 = vector.shape_cast %34 : vector<1x1x4x1x8x16xf32> to vector<4x8x16xf32>
    %36 = vector.shape_cast %35 : vector<4x8x16xf32> to vector<32x16xf32>
    %cst_46 = arith.constant dense<0.000000e+00> : vector<32x16xf32>
    %37 = tpu.matmul %33, %0, %cst_46 {dimension_numbers = #tpu.dot_dimension_numbers<[1], [0], [0], [1], [0, 0, 1, 1], [], []>, precision = #tpu.contract_precision<fp32>} : vector<32x16xf32>, vector<16x16xf32>, vector<32x16xf32> -> vector<32x16xf32>
    %cst_47 = arith.constant dense<0.000000e+00> : vector<32x16xf32>
    %38 = tpu.matmul %36, %0, %cst_47 {dimension_numbers = #tpu.dot_dimension_numbers<[1], [0], [0], [1], [0, 0, 1, 1], [], []>, precision = #tpu.contract_precision<fp32>} : vector<32x16xf32>, vector<16x16xf32>, vector<32x16xf32> -> vector<32x16xf32>
    %39 = arith.addf %37, %38 : vector<32x16xf32>
    %40 = arith.subf %38, %37 : vector<32x16xf32>
    %41 = vector.extract_strided_slice %39 {offsets = [0, 0], sizes = [32, 8], strides = [1, 1]} : vector<32x16xf32> to vector<32x8xf32>
    %42 = vector.extract_strided_slice %39 {offsets = [0, 8], sizes = [32, 8], strides = [1, 1]} : vector<32x16xf32> to vector<32x8xf32>
    %43 = vector.extract_strided_slice %40 {offsets = [0, 0], sizes = [32, 8], strides = [1, 1]} : vector<32x16xf32> to vector<32x8xf32>
    %44 = vector.extract_strided_slice %40 {offsets = [0, 8], sizes = [32, 8], strides = [1, 1]} : vector<32x16xf32> to vector<32x8xf32>
    %45 = vector.shape_cast %41 : vector<32x8xf32> to vector<4x8x8xf32>
    %c0_48 = arith.constant 0 : index
    %c4 = arith.constant 4 : index
    %c0_49 = arith.constant 0 : index
    %c0_50 = arith.constant 0 : index
    %c0_51 = arith.constant 0 : index
    %c0_52 = arith.constant 0 : index
    %46 = vector.load %arg5[%c0_48, %c4, %c0_49, %c0_50, %c0_51, %c0_52] : memref<1x8x1x4x8x8xf32, #tpu.memory_space<vmem>>, vector<1x1x1x4x8x8xf32>
    %47 = vector.shape_cast %46 : vector<1x1x1x4x8x8xf32> to vector<4x8x8xf32>
    %48 = vector.shape_cast %45 : vector<4x8x8xf32> to vector<1x1x1x4x8x8xf32>
    tpu.vector_store %arg5[%c0_48, %c4, %c0_49, %c0_50, %c0_51, %c0_52], %48 {strides = array<i32>} : memref<1x8x1x4x8x8xf32, #tpu.memory_space<vmem>>, vector<1x1x1x4x8x8xf32>,
    %49 = vector.shape_cast %42 : vector<32x8xf32> to vector<4x8x8xf32>
    %c0_53 = arith.constant 0 : index
    %c5 = arith.constant 5 : index
    %c0_54 = arith.constant 0 : index
    %c0_55 = arith.constant 0 : index
    %c0_56 = arith.constant 0 : index
    %c0_57 = arith.constant 0 : index
    %50 = vector.load %arg5[%c0_53, %c5, %c0_54, %c0_55, %c0_56, %c0_57] : memref<1x8x1x4x8x8xf32, #tpu.memory_space<vmem>>, vector<1x1x1x4x8x8xf32>
    %51 = vector.shape_cast %50 : vector<1x1x1x4x8x8xf32> to vector<4x8x8xf32>
    %52 = vector.shape_cast %49 : vector<4x8x8xf32> to vector<1x1x1x4x8x8xf32>
    tpu.vector_store %arg5[%c0_53, %c5, %c0_54, %c0_55, %c0_56, %c0_57], %52 {strides = array<i32>} : memref<1x8x1x4x8x8xf32, #tpu.memory_space<vmem>>, vector<1x1x1x4x8x8xf32>,
    %53 = vector.shape_cast %43 : vector<32x8xf32> to vector<4x8x8xf32>
    %c0_58 = arith.constant 0 : index
    %c6 = arith.constant 6 : index
    %c0_59 = arith.constant 0 : index
    %c0_60 = arith.constant 0 : index
    %c0_61 = arith.constant 0 : index
    %c0_62 = arith.constant 0 : index
    %54 = vector.load %arg5[%c0_58, %c6, %c0_59, %c0_60, %c0_61, %c0_62] : memref<1x8x1x4x8x8xf32, #tpu.memory_space<vmem>>, vector<1x1x1x4x8x8xf32>
    %55 = vector.shape_cast %54 : vector<1x1x1x4x8x8xf32> to vector<4x8x8xf32>
    %56 = vector.shape_cast %53 : vector<4x8x8xf32> to vector<1x1x1x4x8x8xf32>
    tpu.vector_store %arg5[%c0_58, %c6, %c0_59, %c0_60, %c0_61, %c0_62], %56 {strides = array<i32>} : memref<1x8x1x4x8x8xf32, #tpu.memory_space<vmem>>, vector<1x1x1x4x8x8xf32>,
    %57 = vector.shape_cast %44 : vector<32x8xf32> to vector<4x8x8xf32>
    %c0_63 = arith.constant 0 : index
    %c7 = arith.constant 7 : index
    %c0_64 = arith.constant 0 : index
    %c0_65 = arith.constant 0 : index
    %c0_66 = arith.constant 0 : index
    %c0_67 = arith.constant 0 : index
    %58 = vector.load %arg5[%c0_63, %c7, %c0_64, %c0_65, %c0_66, %c0_67] : memref<1x8x1x4x8x8xf32, #tpu.memory_space<vmem>>, vector<1x1x1x4x8x8xf32>
    %59 = vector.shape_cast %58 : vector<1x1x1x4x8x8xf32> to vector<4x8x8xf32>
    %60 = vector.shape_cast %57 : vector<4x8x8xf32> to vector<1x1x1x4x8x8xf32>
    tpu.vector_store %arg5[%c0_63, %c7, %c0_64, %c0_65, %c0_66, %c0_67], %60 {strides = array<i32>} : memref<1x8x1x4x8x8xf32, #tpu.memory_space<vmem>>, vector<1x1x1x4x8x8xf32>,
    return
  }
  func.func @transform_0(%arg0: i32, %arg1: i32, %arg2: i32) -> (i32, i32, i32, i32, i32, i32) {
    %c0_i32 = arith.constant 0 : i32
    %c0_i32_0 = arith.constant 0 : i32
    %c0_i32_1 = arith.constant 0 : i32
    %c0_i32_2 = arith.constant 0 : i32
    return %arg0, %arg1, %arg2, %c0_i32, %c0_i32_0, %c0_i32_1 : i32, i32, i32, i32, i32, i32
  }
  func.func @transform_1(%arg0: i32, %arg1: i32, %arg2: i32) -> (i32, i32) {
    %c0_i32 = arith.constant 0 : i32
    %c0_i32_0 = arith.constant 0 : i32
    %c0_i32_1 = arith.constant 0 : i32
    return %c0_i32, %c0_i32_0 : i32, i32
  }
  func.func @transform_2(%arg0: i32, %arg1: i32, %arg2: i32) -> (i32, i32, i32, i32, i32, i32) {
    %c0_i32 = arith.constant 0 : i32
    %c0_i32_0 = arith.constant 0 : i32
    %c0_i32_1 = arith.constant 0 : i32
    %c0_i32_2 = arith.constant 0 : i32
    return %arg0, %c0_i32, %arg1, %arg2, %c0_i32_0, %c0_i32_1 : i32, i32, i32, i32, i32, i32
  }
}

</mosaic_0001>

<bundles_post_ra>
// kernel: tpu_custom_call.1
= control target key start
LH: loop header
LB: loop body
LE: loop exit
PB: predicated region body
PF: predicated region fallthrough
CT: control target
= control target key end

     0   :  { %s4269_s0 = inlined_call_operand.hbm [shape: f32[2,4,4,2,8,32], index: 0, kind: input, shape index: {}]   ;;  %s4270_s1 = inlined_call_operand.hbm [shape: f32[16,16], index: 1, kind: input, shape index: {}]   ;;  %s4271_s2 = inlined_call_operand.hbm [shape: f32[2,8,4,4,8,8], index: 2, kind: output, shape index: {}]  }
   0x1   :  { %4281 = sst [smem:[#allocation16_spill]] %s4270_s1 }
   0x2   :  { %7 = vsyncpa [#allocation3], 0 }
   0x3   :  { %9 = vsyncpa [#allocation3 + $0x1], 0 }
   0x4   :  { %10 = vsyncpa [#allocation6], 0 }
   0x5   :  { %11 = vsyncpa [#allocation4], 0 }
   0x6   :  { %13 = vsyncpa [#allocation4 + $0x1], 0  ;;  %s3784_s9 = smov 0   ;;  %s3786_s10 = smov 0  }
   0x7   :  { %s3788_s11 = smov 0   ;;  %s3790_s12 = smov 0  }
   0x8   :  { %s3792_s13 = smov 0   ;;  %s3794_s14 = smov 0  }
   0x9   :  { %s3796_s15 = smov 0   ;;  %s3798_s16 = smov 0  }
   0xa LB: > { %4282 = sst [smem:[#allocation13_spill]] %s3746_s14  ;;  %s2905_s17 = sadd.s32 4294967295, %s3754_s16   ;;  %s3754_s16 = sphi %s3798_s16, %s19_s16   ;;  %s3750_s15 = sphi %s3796_s15, %s4309_s15   ;;  %s3746_s14 = sphi %s3794_s14, %s4303_s14   ;;  %s3742_s13 = sphi %s3792_s13, %s4308_s13   ;;  %s3738_s12 = sphi %s3790_s12, %s4302_s12   ;;  %s3734_s11 = sphi %s3788_s11, %s4307_s11   ;;  %s3730_s10 = sphi %s3786_s10, %s4306_s10   ;;  %s3726_s9 = sphi %s3784_s9, %s4305_s9  }
   0xb   : > { %s2906_s18 = sadd.s32 4294967294, %s3754_s16   ;;  %p62_p0 = scmp.ne.s32.totalorder %s3730_s10, %s3726_s9 }
   0xc   : > { %p3828_p1 = scmp.eq.s32.totalorder %s2905_s17, 0  ;;  %p3832_p2 = scmp.eq.s32.totalorder %s2905_s17, 7 }
   0xd   : > { %p117_p3 = scmp.eq.s32.totalorder %s2906_s18, 7  ;;  %p2907_p5 = scmp.ge.s32.totalorder %s3754_s16, 1 }
   0xe   : > { %s4283_s19 = scalar_select %p3828_p1, 1, 0 }
   0xf   : > { %s4284_s20 = scalar_select %p3832_p2, 1, 0 }
  0x10   : > { %p3838_p4 = por %p3828_p1, %p62_p0  ;;  %p3843_p6 = por %p117_p3, %p62_p0 }
  0x11   : > { %p124_p7 = scmp.lt.s32.totalorder %s3754_s16, 9  ;;  %s3756_s24 = smov [#allocation5]  }
  0x12   : > { %s4285_s21 = scalar_select %p3838_p4, 1, 0 }
  0x13   : > { %s4286_s22 = scalar_select %p3843_p6, 1, 0 }
  0x14   : > { %p3848_p8 = pnand %p2907_p5, %p124_p7  ;;  %s136_s25 = sshll.u32 %s3756_s24, 4  ;;  %s137_s25 = int_to_ptr.vmem [resolvable:$true] %s136_s25 }
  0x15   : > { %s4289_s1 = sld [smem:[#allocation16_spill]] }
  0x16   : > { %s4287_s23 = scalar_select %p3848_p8, 1, 0 }
  0x17   : > { %p3530_p9 = pneg %p3848_p8 }
  0x19   : > { %p3856_p10 = pnand %p3530_p9, %p3828_p1 }
  0x1b   : > { %s3622_s29 = scalar_lea.hbm %s4289_s1, 256  ;;  %p3624_p12 = pneg %p3856_p10 }
  0x1c   : > { %p3623_p11 = scmp.ne.s32.totalorder %s4289_s1, %s3622_s29  ;;  %p3629_p3 = scmp.lt.u32.totalorder %s3622_s29, %s4289_s1 }
  0x1e   : > { %p3625_p13 = pnand %p3624_p12, %p3623_p11 }
  0x20   : > { %p3626_p0 = pneg %p3625_p13 }
  0x22   : > { %p3631_p5 = pnand %p3629_p3, %p3626_p0 }
  0x24   : > { %3634 = shalt.err (!%p3631_p5)
}
  0x25   : > { %s3635_s6 = scalar_lea.vmem %s137_s25, 256  ;;  %p3643_p1 = scmp.lt.s32.totalorder %s137_s25, %s137_s25 }
  0x26   : > { %p3636_p7 = scmp.ne.s32.totalorder %s137_s25, %s3635_s6  ;;  %p3644_p4 = scmp.lt.s32.totalorder %s3635_s6, %s3635_s6 }
  0x28   : > { %p3638_p9 = pnand %p3636_p7, %p3624_p12  ;;  %p3645_p8 = por %p3644_p4, %p3643_p1 }
  0x2a   : > { %p3639_p6 = pneg %p3638_p9 }
  0x2c   : > { %p3646_p2 = pnand %p3645_p8, %p3639_p6 }
  0x2e   : > { %3649 = shalt.err (!%p3646_p2)
}
  0x2f   : > { %s4276_s7 = smov 128   ;;  %s4277_s8 = smov 8  }
  0x30   : > { %3533 = dma.hbm_to_vmem [thread:$0]  (!%p3856_p10), %s4289_s1, 256, %s137_s25, [#allocation6], %s4276_s7, %s4276_s7, %s4277_s8  }
  0x31   : > { %s34_s24 = sadd.s32 1, %s3746_s14  ;;  %s38_s27 = sadd.s32 1, %s3750_s15 }
  0x32   : > { %p36_p1 = scmp.ge.s32.totalorder %s34_s24, 4  ;;  %s49_s28 = sadd.s32 1, %s3734_s11 }
  0x33   : > { %p56_p2 = scmp.ne.s32.totalorder %s3734_s11, %s3730_s10  ;;  %p57_p4 = scmp.eq.s32.totalorder %s3754_s16, 0 }
  0x34   : > { %s4311_s24 = smov (%p36_p1, %s34_s24), 0  ;;  %s4313_s27 = smov (!%p36_p1, %s38_s27), %s3750_s15 }
  0x35   : > { %4290 = sst [smem:[#allocation14_spill]] %s4311_s24  ;;  %s43_s26 = ssub.s32 %s3746_s14, %s4311_s24 }
  0x36   : > { %p40_p6 = scmp.ge.s32.totalorder %s4313_s27, 2  ;;  %p4291_p8 = scmp.ne.s32.totalorder %s4284_s20, 0 }
  0x37   : > { %p3896_p10 = por %p57_p4, %p56_p2  ;;  %p3543_p12 = scmp.lt.s32.totalorder %s3754_s16, 8 }
  0x38   : > { %p3892_p11 = por %p4291_p8, %p56_p2  ;;  %s4315_s27 = smov (%p40_p6, %s4313_s27), 0 }
  0x39   : > { %4294 = sst [smem:[#allocation15_spill]] %s4315_s27  ;;  %s150_s30 = sand.u32 1, %s3734_s11  }
  0x3a   : > { %s2911_s3 = sshll.u32 %s3746_s14, 3  ;;  %s42_s4 = ssub.s32 %s3750_s15, %s4315_s27 }
  0x3b   : > { %s44_s5 = sor.u32 %s43_s26, %s42_s4  ;;  %s2910_s6 = sshll.u32 %s150_s30, 6 }
  0x3c   : > { %p47_p13 = scmp.eq.s32.totalorder %s44_s5, 0  ;;  %s2912_s20 = sshll.u32 %s3750_s15, 5 }
  0x3d   : > { %s154_s17 = scalar_lea.vmem [#allocation2], %s2910_s6  ;;  %s163_s8 = sadd.s32 %s2912_s20, %s2911_s3 }
  0x3e   : > { %s166_s18 = sshll.u32 %s154_s17, 4  ;;  %s2913_s1 = sshll.u32 %s163_s8, 7  ;;  %s3911_s18 = int_to_ptr.vmem [resolvable:$true] %s166_s18 }
  0x3f   : > { %s3909_s7 = scalar_select %p47_p13, %s3734_s11, %s49_s28  }
  0x40   : > { %p3917_p0 = pnand %p3543_p12, %p3896_p10  ;;  %s3924_s26 = scalar_lea.hbm %s4269_s0, %s2913_s1 }
  0x41   : > { %s3926_s28 = scalar_lea.sflag [#allocation3], %s150_s30  ;;  %s3650_s8 = scalar_lea.hbm %s3924_s26, 1024 }
  0x42   : > { %p3651_p3 = scmp.ne.s32.totalorder %s3924_s26, %s3650_s8  ;;  %p3652_p5 = pneg %p3917_p0 }
  0x43   : > { %s3655_s27 = scalar_lea.hbm %s4269_s0, 8192  ;;  %p3656_p1 = scmp.lt.u32.totalorder %s3924_s26, %s4269_s0 }
  0x44   : > { %p3653_p7 = pnand %p3652_p5, %p3651_p3  ;;  %p3657_p2 = scmp.lt.u32.totalorder %s3655_s27, %s3650_s8 }
  0x45   : > { %p3659_p6 = scmp.lt.u32.totalorder %s3650_s8, %s3924_s26 }
  0x46   : > { %p3654_p9 = pneg %p3653_p7  ;;  %p3658_p4 = por %p3657_p2, %p3656_p1 }
  0x48   : > { %p3660_p8 = por %p3659_p6, %p3658_p4 }
  0x4a   : > { %p3661_p10 = pnand %p3660_p8, %p3654_p9 }
  0x4c   : > { %3664 = shalt.err (!%p3661_p10)
}
  0x4d   : > { %s3665_s30 = scalar_lea.vmem %s3911_s18, 1024  ;;  %s3759_s4 = smov [#allocation2]  }
  0x4e   : > { %p3666_p12 = scmp.ne.s32.totalorder %s3911_s18, %s3665_s30  ;;  %s3670_s5 = sshll.u32 %s3759_s4, 4  ;;  %s3671_s5 = int_to_ptr.vmem [resolvable:$false] %s3670_s5 }
  0x4f   : > { %s3672_s6 = scalar_lea.vmem %s3671_s5, 2048  ;;  %p3673_p7 = scmp.lt.s32.totalorder %s3911_s18, %s3671_s5 }
  0x50   : > { %p3668_p13 = pnand %p3666_p12, %p3652_p5  ;;  %p3674_p1 = scmp.lt.s32.totalorder %s3672_s6, %s3665_s30 }
  0x52   : > { %p3669_p3 = pneg %p3668_p13  ;;  %p3675_p2 = por %p3674_p1, %p3673_p7 }
  0x54   : > { %p3676_p4 = pnand %p3675_p2, %p3669_p3 }
  0x56   : > { %3679 = shalt.err (!%p3676_p4)
}
  0x57   : > { %s4296_s20 = smov 8   ;;  %s4297_s17 = smov 128  }
  0x58   : > { %3537 = dma.hbm_to_vmem [thread:$0]  (!%p3917_p0), %s3924_s26, 1024, %s3911_s18, %s3926_s28, %s4297_s17, %s4297_s17, %s4296_s20  }
  0x59   : > { %p4298_p5 = scmp.ne.s32.totalorder %s4287_s23, 0 }
  0x5a   : > { %s3960_s8 = sand.u32 (!%p4298_p5), 1, %s3730_s10   ;;  %p4299_p9 = scmp.ne.s32.totalorder (!%p4298_p5), %s4285_s21, 0 }
  0x5b   : > { %178 = sbr.rel (%p4298_p5) target bundleno = 676 (0x2a4), region = 28  ;;  %s2915_s25 = sshll.u32 (!%p4298_p5), %s3960_s8, 6 }
  0x5c   : > { %s181_s14 = scalar_lea.sflag (!%p4298_p5), [#allocation3], %s3960_s8  ;;  %s3964_s27 = scalar_lea.vmem (!%p4298_p5), [#allocation2], %s2915_s25 }
  0x62   : > { %3713 = dma.done.wait (%p4299_p9), %s181_s14, 1024  }
  0x63   : > { %3715 = vsyncadd (%p4299_p9), %s181_s14, 4294966272  ;;  %p4300_p0 = scmp.ne.s32.totalorder %s4283_s19, 0 }
  0x65   : > { %3717 = dma.done.wait (%p4300_p0), [#allocation6], 256  }
  0x66   : > { %3719 = vsyncadd (%p4300_p0), [#allocation6], 4294967040  ;;  %vm217_vm0 = vcmask 130048   ;;  %v215_v0 = vld [vmem:[%s3964_s27 + $0x20] sm:$0xff]  ;;  %v216_v2 = vld [vmem:[%s3964_s27 + $0x30] sm:$0xff]  ;;  %s3760_s23 = smov 112  }
  0x67   : > { %v213_v1 = vld [vmem:[%s3964_s27] sm:$0xff]  ;;  %822 = vrot.lane.b32.xlu1 %v215_v0, %s3760_s23  ;;  %v225_v3 = vsel %vm217_vm0, %v215_v0, 0  ;;  %v228_v5 = vsel %vm217_vm0, %v216_v2, 0  ;;  %v214_v6 = vld [vmem:[%s3964_s27 + $0x10] sm:$0xff]  ;;  %v212_v13 = vld [vmem:[#allocation5 + $0x8] sm:$0xff]  ;;  %s2917_s19 = sshll.u32 %s3960_s8, 8 }
  0x68   : > { %818 = vrot.lane.b32.xlu0 %v213_v1, %s3760_s23  ;;  %v219_v4 = vsel %vm217_vm0, %v213_v1, 0  ;;  %v3983_v7 = vand.u32 4294901760, %v225_v3  ;;  %v3987_v9 = vand.u32 4294901760, %v228_v5  ;;  %v222_v10 = vsel %vm217_vm0, %v214_v6, 0  ;;  %v211_v12 = vld [vmem:[#allocation5] sm:$0xff]  ;;  %v2930_v18 = vld [vmem:[%s3964_s27 + $0x8] sm:$0xff] }
  0x69   : > { %v3985_v8 = vand.u32 4294901760, %v219_v4  ;;  %v3990_v11 = vand.u32 4294901760, %v222_v10  ;;  %v2931_v19 = vld [vmem:[%s3964_s27 + $0x18] sm:$0xff]  ;;  %v231_v20 = vand.u32 4294901760, %v211_v12  ;;  %v234_v21 = vand.u32 4294901760, %v212_v13  ;;  %v2932_v30 = vld [vmem:[%s3964_s27 + $0x28] sm:$0xff] }
  0x6a   : > { %v3993_v14 = vsub.f32 %v225_v3, %v3983_v7  ;;  %v3999_v16 = vsub.f32 %v228_v5, %v3987_v9  ;;  %v2933_v31 = vld [vmem:[%s3964_s27 + $0x38] sm:$0xff]  ;;  %v1488_v48 = vsel %vm217_vm0, %v2930_v18, 0  ;;  %v1491_v50 = vsel %vm217_vm0, %v2931_v19, 0  ;;  %s4138_s21 = scalar_lea.vmem [#allocation7], %s2917_s19  ;;  %s3761_s24 = smov 120  }
  0x6b   : > { %v3996_v15 = vsub.f32 %v219_v4, %v3985_v8  ;;  %824 = vrot.lane.b32.xlu1 %v216_v2, %s3760_s23  ;;  %v308_v17 = vsub.f32 %v222_v10, %v3990_v11  ;;  %v4007_v24 = vpack.c.bf16 %v234_v21, %v231_v20  ;;  %v339_v29 = vsub.f32 %v211_v12, %v231_v20  ;;  %s2752_s18 = scalar_lea.sflag [#allocation4], %s3960_s8 }
  0x6c   : > { %820 = vrot.lane.b32.xlu0 %v214_v6, %s3760_s23  ;;  %v319_v25 = vand.u32 4294901760, %v3993_v14  ;;  %v329_v26 = vand.u32 4294901760, %v3999_v16  ;;  %v346_v33 = vsub.f32 %v212_v13, %v234_v21  ;;  %v4046_v49 = vand.u32 4294901760, %v1488_v48 }
  0x6d   : > { %v299_v22 = vand.u32 4294901760, %v3996_v15  ;;  %v309_v23 = vand.u32 4294901760, %v308_v17  ;;  %3341 = vmatprep.subr.bf16.mxu0 %v4007_v24  ;;  %3365 = vmatprep.subr.bf16.mxu1 %v4007_v24  ;;  %v340_v37 = vand.u32 4294901760, %v339_v29  ;;  %v1494_v51 = vsel %vm217_vm0, %v2932_v30, 0 }
  0x6e   : > { %v320_v32 = vsub.f32 %v3993_v14, %v319_v25  ;;  %3343 = vmatpush3.bf16.msra.mxu0 %v4007_v24  ;;  %v330_v36 = vsub.f32 %v3999_v16, %v329_v26  ;;  %3367 = vmatpush3.bf16.msra.mxu1 %v4007_v24  ;;  %v347_v39 = vand.u32 4294901760, %v346_v33  ;;  %v4026_v46 = vpack.c.bf16 %v346_v33, %v339_v29 }
  0x6f   : > { %2089 = vrot.lane.b32.xlu1 %v2931_v19, %s3760_s23  ;;  %v300_v27 = vsub.f32 %v3996_v15, %v299_v22  ;;  %v310_v28 = vsub.f32 %v308_v17, %v309_v23  ;;  %v341_v40 = vsub.f32 %v339_v29, %v340_v37  ;;  %v1576_v52 = vand.u32 4294901760, %v1491_v50 }
  0x70   : > { %2087 = vrot.lane.b32.xlu0 %v2930_v18, %s3760_s23  ;;  %v321_v38 = vand.u32 4294901760, %v320_v32  ;;  %v348_v41 = vsub.f32 %v346_v33, %v347_v39  ;;  %v331_v42 = vand.u32 4294901760, %v330_v36  ;;  %v4039_v47 = vpack.c.bf16 %v347_v39, %v340_v37 }
  0x71   : > { %v301_v34 = vand.u32 4294901760, %v300_v27  ;;  %v311_v35 = vand.u32 4294901760, %v310_v28  ;;  %v342_v43 = vand.u32 4294901760, %v341_v40  ;;  %v1567_v53 = vsub.f32 %v1488_v48, %v4046_v49 }
  0x72   : > { %v349_v44 = vand.u32 4294901760, %v348_v41  ;;  %v1586_v54 = vand.u32 4294901760, %v1494_v51  ;;  %v1497_v55 = vsel %vm217_vm0, %v2933_v31, 0  ;;  %v1577_v56 = vsub.f32 %v1491_v50, %v1576_v52 }
  0x73   : > { %2093 = vrot.lane.b32.xlu1 %v2933_v31, %s3760_s23  ;;  %3104 = vmatprep.mubr.f32.mxu0 %v301_v34  ;;  %v1596_v57 = vand.u32 4294901760, %v1497_v55  ;;  %v1568_v59 = vand.u32 4294901760, %v1567_v53  ;;  %vm1430_vm1 = vcmask 64512  }
  0x74   : > { %2091 = vrot.lane.b32.xlu0 %v2932_v30, %s3760_s23  ;;  %3105 = vmatmul.mubr.f32.vlgmr.msra.gmra.mrb[0].mxu0 %v311_v35  ;;  %v4024_v45 = vpack.c.bf16 %v349_v44, %v342_v43  ;;  %v1587_v58 = vsub.f32 %v1494_v51, %v1586_v54  ;;  %v1578_v60 = vand.u32 4294901760, %v1577_v56 }
  0x75   : > { %3107 = vmatprep.mubr.f32.mxu0 %v321_v38  ;;  %v1597_v61 = vsub.f32 %v1497_v55, %v1596_v57  ;;  %v1569_v62 = vsub.f32 %v1567_v53, %v1568_v59 }
  0x76   : > { %3345 = vmatprep.subr.bf16.mxu0 %v4024_v45  ;;  %3369 = vmatprep.subr.bf16.mxu1 %v4024_v45  ;;  %v1588_v63 = vand.u32 4294901760, %v1587_v58  ;;  %v1579_v0 = vsub.f32 %v1577_v56, %v1578_v60 }
  0x77   : > { %3347 = vmatpush3.bf16.msra.mxu0 %v4024_v45  ;;  %v1598_v1 = vand.u32 4294901760, %v1597_v61  ;;  %v1570_v2 = vand.u32 4294901760, %v1569_v62 }
  0x78   : > { %3108 = vmatmul.mubr.f32.gmra.mrb[2].mxu0 %v331_v42  ;;  %3349 = vmatprep.subr.bf16.mxu0 %v4026_v46  ;;  %v1589_v3 = vsub.f32 %v1587_v58, %v1588_v63  ;;  %v1580_v4 = vand.u32 4294901760, %v1579_v0 }
  0x79   : > { %3114 = vmatprep.mubr.f32.mxu0 %v3985_v8  ;;  %v1599_v5 = vsub.f32 %v1597_v61, %v1598_v1 }
  0x7a   : > { %v1590_v6 = vand.u32 4294901760, %v1589_v3 }
  0x7c   : > { %3115 = vmatmul.mubr.f32.vlgmr.msra.gmra.mrb[0].mxu0 %v3990_v11 }
  0x7d   : > { %3117 = vmatprep.mubr.f32.mxu0 %v3983_v7  ;;  %3351 = vmatpush3.bf16.msra.mxu0 %v4026_v46 }
  0x7e   : > { %3353 = vmatprep.subr.bf16.mxu0 %v4007_v24 }
  0x80   : > { %3118 = vmatmul.mubr.f32.gmra.mrb[2].mxu0 %v3987_v9 }
  0x81   : > { %3124 = vmatprep.mubr.f32.mxu0 %v3996_v15 }
  0x84   : > { %3125 = vmatmul.mubr.f32.vlgmr.msra.gmra.mrb[0].mxu0 %v308_v17 }
  0x85   : > { %3127 = vmatprep.mubr.f32.mxu0 %v3993_v14  ;;  %3355 = vmatpush3.bf16.msra.mxu0 %v4007_v24 }
  0x86   : > { %3357 = vmatprep.subr.bf16.mxu0 %v4039_v47 }
  0x88   : > { %3128 = vmatmul.mubr.f32.gmra.mrb[2].mxu0 %v3999_v16 }
  0x89   : > { %3134 = vmatprep.mubr.f32.mxu0 %v299_v22 }
  0x8c   : > { %3135 = vmatmul.mubr.f32.vlgmr.msra.gmra.mrb[0].mxu0 %v309_v23 }
  0x8d   : > { %3137 = vmatprep.mubr.f32.mxu0 %v319_v25  ;;  %3359 = vmatpush3.bf16.msra.mxu0 %v4039_v47 }
  0x8e   : > { %3361 = vmatprep.subr.bf16.mxu0 %v4007_v24 }
  0x90   : > { %3138 = vmatmul.mubr.f32.gmra.mrb[2].mxu0 %v329_v26 }
  0x91   : > { %3144 = vmatprep.mubr.f32.mxu0 %v3985_v8 }
  0x94   : > { %3145 = vmatmul.mubr.f32.vlgmr.msra.gmra.mrb[0].mxu0 %v3990_v11 }
  0x95   : > { %3147 = vmatprep.mubr.f32.mxu0 %v3983_v7  ;;  %3363 = vmatpush3.bf16.msra.mxu0 %v4007_v24 }
  0x96   : > { %3389 = vmatprep.subr.bf16.mxu0 %v4007_v24 }
  0x98   : > { %3148 = vmatmul.mubr.f32.gmra.mrb[2].mxu0 %v3987_v9 }
  0x99   : > { %3154 = vmatprep.mubr.f32.mxu0 %v3985_v8  ;;  %v1600_v8 = vand.u32 4294901760, %v1599_v5 }
  0x9c   : > { %3155 = vmatmul.mubr.f32.vlgmr.msra.gmra.mrb[0].mxu0 %v3990_v11 }
  0x9d   : > { %3157 = vmatprep.mubr.f32.mxu0 %v3983_v7  ;;  %3391 = vmatpush3.bf16.msra.mxu0 %v4007_v24 }
  0x9e   : > { %3393 = vmatprep.subr.bf16.mxu0 %v4024_v45 }
  0xa0   : > { %3158 = vmatmul.mubr.f32.gmra.mrb[2].mxu0 %v3987_v9 }
  0xa1   : > { %3224 = vmatprep.mubr.f32.mxu0 %v1570_v2 }
  0xa4   : > { %3225 = vmatmul.mubr.f32.vlgmr.msra.gmra.mrb[4].mxu0 %v1580_v4 }
  0xa5   : > { %3227 = vmatprep.mubr.f32.mxu0 %v1590_v6  ;;  %3395 = vmatpush3.bf16.msra.mxu0 %v4024_v45 }
  0xa6   : > { %3397 = vmatprep.subr.bf16.mxu0 %v4026_v46 }
  0xa8   : > { %3228 = vmatmul.mubr.f32.gmra.mrb[6].mxu0 %v1600_v8 }
  0xa9   : > { %3234 = vmatprep.mubr.f32.mxu0 %v4046_v49 }
  0xac   : > { %3235 = vmatmul.mubr.f32.vlgmr.msra.gmra.mrb[4].mxu0 %v1576_v52 }
  0xad   : > { %3237 = vmatprep.mubr.f32.mxu0 %v1586_v54  ;;  %3399 = vmatpush3.bf16.msra.mxu0 %v4026_v46 }
  0xae   : > { %3401 = vmatprep.subr.bf16.mxu0 %v4007_v24 }
  0xb0   : > { %3238 = vmatmul.mubr.f32.gmra.mrb[6].mxu0 %v1596_v57 }
  0xb1   : > { %3244 = vmatprep.mubr.f32.mxu0 %v1567_v53 }
  0xb4   : > { %3245 = vmatmul.mubr.f32.vlgmr.msra.gmra.mrb[4].mxu0 %v1577_v56 }
  0xb5   : > { %3247 = vmatprep.mubr.f32.mxu0 %v1587_v58  ;;  %3403 = vmatpush3.bf16.msra.mxu0 %v4007_v24 }
  0xb6   : > { %3405 = vmatprep.subr.bf16.mxu0 %v4039_v47 }
  0xb8   : > { %3248 = vmatmul.mubr.f32.gmra.mrb[6].mxu0 %v1597_v61 }
  0xb9   : > { %3254 = vmatprep.mubr.f32.mxu0 %v1568_v59 }
  0xbc   : > { %3255 = vmatmul.mubr.f32.vlgmr.msra.gmra.mrb[4].mxu0 %v1578_v60 }
  0xbd   : > { %3257 = vmatprep.mubr.f32.mxu0 %v1588_v63  ;;  %3407 = vmatpush3.bf16.msra.mxu0 %v4039_v47 }
  0xbe   : > { %3409 = vmatprep.subr.bf16.mxu0 %v4007_v24 }
  0xc0   : > { %3258 = vmatmul.mubr.f32.gmra.mrb[6].mxu0 %v1598_v1 }
  0xc1   : > { %3264 = vmatprep.mubr.f32.mxu0 %v4046_v49 }
  0xc4   : > { %3265 = vmatmul.mubr.f32.vlgmr.msra.gmra.mrb[4].mxu0 %v1576_v52 }
  0xc5   : > { %3267 = vmatprep.mubr.f32.mxu0 %v1586_v54  ;;  %3411 = vmatpush3.bf16.msra.mxu0 %v4007_v24 }
  0xc8   : > { %3268 = vmatmul.mubr.f32.gmra.mrb[6].mxu0 %v1596_v57 }
  0xc9   : > { %3274 = vmatprep.mubr.f32.mxu0 %v4046_v49 }
  0xcc   : > { %3275 = vmatmul.mubr.f32.vlgmr.msra.gmra.mrb[4].mxu0 %v1576_v52 }
  0xcd   : > { %3277 = vmatprep.mubr.f32.mxu0 %v1586_v54 }
  0xd0   : > { %3278 = vmatmul.mubr.f32.gmra.mrb[6].mxu0 %v1596_v57 }
  0xd9   : > { %v823_v7 = vpop.permute.xlu1 %822 }
  0xda   : > { %v819_v9 = vpop.permute.xlu0 %818  ;;  %v830_v10 = vsel %vm217_vm0, %v823_v7, 0 }
  0xdb   : > { %v826_v11 = vsel %vm217_vm0, %v819_v9, 0  ;;  %v4080_v12 = vand.u32 4294901760, %v830_v10 }
  0xdc   : > { %v4082_v13 = vand.u32 4294901760, %v826_v11 }
  0xdd   : > { %v922_v14 = vsub.f32 %v830_v10, %v4080_v12  ;;  %v825_v16 = vpop.permute.xlu1 %824 }
  0xde   : > { %v902_v15 = vsub.f32 %v826_v11, %v4082_v13  ;;  %v821_v17 = vpop.permute.xlu0 %820  ;;  %v832_v18 = vsel %vm217_vm0, %v825_v16, 0 }
  0xdf   : > { %v828_v19 = vsel %vm217_vm0, %v821_v17, 0  ;;  %v4088_v20 = vand.u32 4294901760, %v832_v18  ;;  %v923_v23 = vand.u32 4294901760, %v922_v14 }
  0xe0   : > { %v4090_v21 = vand.u32 4294901760, %v828_v19  ;;  %v903_v22 = vand.u32 4294901760, %v902_v15 }
  0xe1   : > { %v932_v25 = vsub.f32 %v832_v18, %v4088_v20  ;;  %v924_v31 = vsub.f32 %v922_v14, %v923_v23  ;;  %v2090_v38 = vpop.permute.xlu1 %2089 }
  0xe2   : > { %v912_v26 = vsub.f32 %v828_v19, %v4090_v21  ;;  %v904_v27 = vsub.f32 %v902_v15, %v903_v22  ;;  %v2088_v37 = vpop.permute.xlu0 %2087  ;;  %v2097_v42 = vsel %vm217_vm0, %v2090_v38, 0 }
  0xe3   : > { %v933_v28 = vand.u32 4294901760, %v932_v25  ;;  %v925_v35 = vand.u32 4294901760, %v924_v31  ;;  %v2095_v39 = vsel %vm217_vm0, %v2088_v37, 0  ;;  %v2180_v48 = vand.u32 4294901760, %v2097_v42 }
  0xe4   : > { %v913_v29 = vand.u32 4294901760, %v912_v26  ;;  %v905_v30 = vand.u32 4294901760, %v904_v27  ;;  %v4107_v41 = vand.u32 4294901760, %v2095_v39 }
  0xe5   : > { %v934_v34 = vsub.f32 %v932_v25, %v933_v28  ;;  %v2094_v44 = vpop.permute.xlu1 %2093  ;;  %v2181_v52 = vsub.f32 %v2097_v42, %v2180_v48 }
  0xe6   : > { %3164 = vmatprep.mubr.f32.mxu1 %v905_v30  ;;  %v914_v32 = vsub.f32 %v912_v26, %v913_v29  ;;  %v2092_v40 = vpop.permute.xlu0 %2091  ;;  %v2171_v49 = vsub.f32 %v2095_v39, %v4107_v41  ;;  %v2101_v51 = vsel %vm217_vm0, %v2094_v44, 0 }
  0xe7   : > { %v935_v36 = vand.u32 4294901760, %v934_v34  ;;  %v2099_v43 = vsel %vm217_vm0, %v2092_v40, 0  ;;  %v2200_v53 = vand.u32 4294901760, %v2101_v51  ;;  %v2182_v56 = vand.u32 4294901760, %v2181_v52 }
  0xe8   : > { %v915_v33 = vand.u32 4294901760, %v914_v32  ;;  %v2190_v50 = vand.u32 4294901760, %v2099_v43  ;;  %v2172_v54 = vand.u32 4294901760, %v2171_v49 }
  0xe9   : > { %v2201_v57 = vsub.f32 %v2101_v51, %v2200_v53  ;;  %v2183_v60 = vsub.f32 %v2181_v52, %v2182_v56 }
  0xea   : > { %3165 = vmatmul.mubr.f32.vlgmr.msra.gmra.mrb[0].mxu1 %v915_v33  ;;  %v2191_v55 = vsub.f32 %v2099_v43, %v2190_v50  ;;  %v2173_v59 = vsub.f32 %v2171_v49, %v2172_v54 }
  0xeb   : > { %3371 = vmatpush3.bf16.msra.mxu1 %v4024_v45  ;;  %3167 = vmatprep.mubr.f32.mxu1 %v925_v35  ;;  %v2202_v61 = vand.u32 4294901760, %v2201_v57  ;;  %v2184_v0 = vand.u32 4294901760, %v2183_v60 }
  0xec   : > { %3373 = vmatprep.subr.bf16.mxu1 %v4026_v46  ;;  %v2192_v58 = vand.u32 4294901760, %v2191_v55  ;;  %v2174_v62 = vand.u32 4294901760, %v2173_v59 }
  0xed   : > { %v2203_v1 = vsub.f32 %v2201_v57, %v2202_v61 }
  0xee   : > { %3168 = vmatmul.mubr.f32.gmra.mrb[2].mxu1 %v935_v36  ;;  %v2193_v63 = vsub.f32 %v2191_v55, %v2192_v58 }
  0xef   : > { %3174 = vmatprep.mubr.f32.mxu1 %v4082_v13  ;;  %v2204_v3 = vand.u32 4294901760, %v2203_v1 }
  0xf0   : > { %v2194_v2 = vand.u32 4294901760, %v2193_v63 }
  0xf2   : > { %3175 = vmatmul.mubr.f32.vlgmr.msra.gmra.mrb[0].mxu1 %v4090_v21 }
  0xf3   : > { %3375 = vmatpush3.bf16.msra.mxu1 %v4026_v46  ;;  %3177 = vmatprep.mubr.f32.mxu1 %v4080_v12 }
  0xf4   : > { %3377 = vmatprep.subr.bf16.mxu1 %v4007_v24 }
  0xf6   : > { %3178 = vmatmul.mubr.f32.gmra.mrb[2].mxu1 %v4088_v20 }
  0xf7   : > { %3184 = vmatprep.mubr.f32.mxu1 %v902_v15 }
  0xfa   : > { %3185 = vmatmul.mubr.f32.vlgmr.msra.gmra.mrb[0].mxu1 %v912_v26 }
  0xfb   : > { %3379 = vmatpush3.bf16.msra.mxu1 %v4007_v24  ;;  %3187 = vmatprep.mubr.f32.mxu1 %v922_v14 }
  0xfc   : > { %3381 = vmatprep.subr.bf16.mxu1 %v4039_v47 }
  0xfe   : > { %3188 = vmatmul.mubr.f32.gmra.mrb[2].mxu1 %v932_v25 }
  0xff   : > { %3194 = vmatprep.mubr.f32.mxu1 %v903_v22 }
 0x102   : > { %3195 = vmatmul.mubr.f32.vlgmr.msra.gmra.mrb[0].mxu1 %v913_v29 }
 0x103   : > { %3383 = vmatpush3.bf16.msra.mxu1 %v4039_v47  ;;  %3197 = vmatprep.mubr.f32.mxu1 %v923_v23 }
 0x104   : > { %3385 = vmatprep.subr.bf16.mxu1 %v4007_v24 }
 0x106   : > { %3198 = vmatmul.mubr.f32.gmra.mrb[2].mxu1 %v933_v28 }
 0x107   : > { %3204 = vmatprep.mubr.f32.mxu1 %v4082_v13 }
 0x10a   : > { %3205 = vmatmul.mubr.f32.vlgmr.msra.gmra.mrb[0].mxu1 %v4090_v21 }
 0x10b   : > { %3387 = vmatpush3.bf16.msra.mxu1 %v4007_v24  ;;  %3207 = vmatprep.mubr.f32.mxu1 %v4080_v12 }
 0x10c   : > { %3413 = vmatprep.subr.bf16.mxu1 %v4007_v24 }
 0x10e   : > { %3208 = vmatmul.mubr.f32.gmra.mrb[2].mxu1 %v4088_v20 }
 0x10f   : > { %3214 = vmatprep.mubr.f32.mxu1 %v4082_v13 }
 0x112   : > { %3215 = vmatmul.mubr.f32.vlgmr.msra.gmra.mrb[0].mxu1 %v4090_v21 }
 0x113   : > { %3415 = vmatpush3.bf16.msra.mxu1 %v4007_v24  ;;  %3217 = vmatprep.mubr.f32.mxu1 %v4080_v12 }
 0x114   : > { %3417 = vmatprep.subr.bf16.mxu1 %v4024_v45 }
 0x116   : > { %3218 = vmatmul.mubr.f32.gmra.mrb[2].mxu1 %v4088_v20 }
 0x117   : > { %3284 = vmatprep.mubr.f32.mxu1 %v2174_v62 }
 0x11a   : > { %3285 = vmatmul.mubr.f32.vlgmr.msra.gmra.mrb[4].mxu1 %v2184_v0 }
 0x11b   : > { %3419 = vmatpush3.bf16.msra.mxu1 %v4024_v45  ;;  %3287 = vmatprep.mubr.f32.mxu1 %v2194_v2 }
 0x11c   : > { %3421 = vmatprep.subr.bf16.mxu1 %v4026_v46 }
 0x11e   : > { %3288 = vmatmul.mubr.f32.gmra.mrb[6].mxu1 %v2204_v3 }
 0x11f   : > { %3294 = vmatprep.mubr.f32.mxu1 %v4107_v41 }
 0x122   : > { %3295 = vmatmul.mubr.f32.vlgmr.msra.gmra.mrb[4].mxu1 %v2180_v48 }
 0x123   : > { %3423 = vmatpush3.bf16.msra.mxu1 %v4026_v46  ;;  %3297 = vmatprep.mubr.f32.mxu1 %v2190_v50 }
 0x124   : > { %3425 = vmatprep.subr.bf16.mxu1 %v4007_v24 }
 0x126   : > { %3298 = vmatmul.mubr.f32.gmra.mrb[6].mxu1 %v2200_v53 }
 0x127   : > { %3304 = vmatprep.mubr.f32.mxu1 %v2171_v49 }
 0x12a   : > { %3305 = vmatmul.mubr.f32.vlgmr.msra.gmra.mrb[4].mxu1 %v2181_v52 }
 0x12b   : > { %3427 = vmatpush3.bf16.msra.mxu1 %v4007_v24  ;;  %3307 = vmatprep.mubr.f32.mxu1 %v2191_v55 }
 0x12c   : > { %3429 = vmatprep.subr.bf16.mxu1 %v4039_v47 }
 0x12e   : > { %3308 = vmatmul.mubr.f32.gmra.mrb[6].mxu1 %v2201_v57 }
 0x12f   : > { %3314 = vmatprep.mubr.f32.mxu1 %v2172_v54 }
 0x132   : > { %3315 = vmatmul.mubr.f32.vlgmr.msra.gmra.mrb[4].mxu1 %v2182_v56 }
 0x133   : > { %3431 = vmatpush3.bf16.msra.mxu1 %v4039_v47  ;;  %3317 = vmatprep.mubr.f32.mxu1 %v2192_v58 }
 0x134   : > { %3433 = vmatprep.subr.bf16.mxu1 %v4007_v24 }
 0x136   : > { %3318 = vmatmul.mubr.f32.gmra.mrb[6].mxu1 %v2202_v61 }
 0x137   : > { %3324 = vmatprep.mubr.f32.mxu1 %v4107_v41 }
 0x13a   : > { %3325 = vmatmul.mubr.f32.vlgmr.msra.gmra.mrb[4].mxu1 %v2180_v48 }
 0x13b   : > { %3435 = vmatpush3.bf16.msra.mxu1 %v4007_v24  ;;  %3327 = vmatprep.mubr.f32.mxu1 %v2190_v50 }
 0x13e   : > { %3328 = vmatmul.mubr.f32.gmra.mrb[6].mxu1 %v2200_v53 }
 0x13f   : > { %3334 = vmatprep.mubr.f32.mxu1 %v4107_v41 }
 0x142   : > { %3335 = vmatmul.mubr.f32.vlgmr.msra.gmra.mrb[4].mxu1 %v2180_v48 }
 0x143   : > { %3337 = vmatprep.mubr.f32.mxu1 %v2190_v50 }
 0x146   : > { %3338 = vmatmul.mubr.f32.gmra.mrb[6].mxu1 %v2200_v53 }
 0x16f   : > { %v3156_v45 = vpop.f32.mrb[0].mxu0 }
 0x170   : > { %v796_v46 = vpop.f32.mrb[1].mxu0 }
 0x173   : > { %v3159_v47 = vpop.f32.mrb[2].mxu0 }
 0x174   : > { %v808_v4 = vpop.f32.mrb[3].mxu0 }
 0x19f   : > { %v3276_v5 = vpop.f32.mrb[4].mxu0 }
 0x1a0   : > { %v2065_v6 = vpop.f32.mrb[5].mxu0 }
 0x1a3   : > { %v3279_v8 = vpop.f32.mrb[6].mxu0 }
 0x1a4   : > { %v2077_v7 = vpop.f32.mrb[7].mxu0 }
 0x1e5   : > { %v3216_v9 = vpop.f32.mrb[0].mxu1 }
 0x1e6   : > { %v1423_v10 = vadd.f32 %v3216_v9, %v3156_v45  ;;  %v1427_v24 = vsub.f32 %v3216_v9, %v3156_v45  ;;  %v1400_v11 = vpop.f32.mrb[1].mxu1 }
 0x1e7   : > { %v1422_v12 = vadd.f32 %v1400_v11, %v796_v46  ;;  %v1426_v13 = vsub.f32 %v1400_v11, %v796_v46 }
 0x1e8   : > { %1432 = vst.msk [vmem:[%s4138_s21 + $0x8] sm:$0xff] %vm1430_vm1, %v1423_v10  ;;  %2923 = vst.msk [vmem:[%s4138_s21 + $0x48] sm:$0xff] %vm1430_vm1, %v1427_v24  ;;  %1441 = vrot.lane.b32.xlu1 %v1423_v10, %s3761_s24 }
 0x1e9   : > { %1431 = vst.msk [vmem:[%s4138_s21] sm:$0xff] %vm1430_vm1, %v1422_v12  ;;  %2922 = vst.msk [vmem:[%s4138_s21 + $0x40] sm:$0xff] %vm1430_vm1, %v1426_v13  ;;  %v3219_v14 = vpop.f32.mrb[2].mxu1  ;;  %1439 = vrot.lane.b32.xlu0 %v1422_v12, %s3761_s24 }
 0x1ea   : > { %v1425_v15 = vadd.f32 %v3219_v14, %v3159_v47  ;;  %v1429_v16 = vsub.f32 %v3219_v14, %v3159_v47  ;;  %v1412_v17 = vpop.f32.mrb[3].mxu1 }
 0x1eb   : > { %v1424_v18 = vadd.f32 %v1412_v17, %v808_v4  ;;  %v1428_v19 = vsub.f32 %v1412_v17, %v808_v4 }
 0x1ec   : > { %1434 = vst.msk [vmem:[%s4138_s21 + $0x18] sm:$0xff] %vm1430_vm1, %v1425_v15  ;;  %2925 = vst.msk [vmem:[%s4138_s21 + $0x58] sm:$0xff] %vm1430_vm1, %v1429_v16  ;;  %1467 = vrot.lane.b32.xlu1 %v1427_v24, %s3761_s24 }
 0x1ed   : > { %1433 = vst.msk [vmem:[%s4138_s21 + $0x10] sm:$0xff] %vm1430_vm1, %v1424_v18  ;;  %2924 = vst.msk [vmem:[%s4138_s21 + $0x50] sm:$0xff] %vm1430_vm1, %v1428_v19  ;;  %1465 = vrot.lane.b32.xlu0 %v1426_v13, %s3761_s24 }
 0x1f0   : > { %1445 = vrot.lane.b32.xlu1 %v1425_v15, %s3761_s24 }
 0x1f1   : > { %1443 = vrot.lane.b32.xlu0 %v1424_v18, %s3761_s24 }
 0x1f4   : > { %1471 = vrot.lane.b32.xlu1 %v1429_v16, %s3761_s24 }
 0x1f5   : > { %1469 = vrot.lane.b32.xlu0 %v1428_v19, %s3761_s24 }
 0x215   : > { %v3336_v20 = vpop.f32.mrb[4].mxu1 }
 0x216   : > { %v2692_v21 = vadd.f32 %v3336_v20, %v3276_v5  ;;  %v2696_v22 = vsub.f32 %v3336_v20, %v3276_v5  ;;  %v2669_v23 = vpop.f32.mrb[5].mxu1 }
 0x217   : > { %v2691_v25 = vadd.f32 %v2669_v23, %v2065_v6  ;;  %v2695_v26 = vsub.f32 %v2669_v23, %v2065_v6 }
 0x218   : > { %2935 = vst.msk [vmem:[%s4138_s21 + $0x88] sm:$0xff] %vm1430_vm1, %v2692_v21  ;;  %2943 = vst.msk [vmem:[%s4138_s21 + $0xc8] sm:$0xff] %vm1430_vm1, %v2696_v22  ;;  %2710 = vrot.lane.b32.xlu1 %v2692_v21, %s3761_s24 }
 0x219   : > { %2934 = vst.msk [vmem:[%s4138_s21 + $0x80] sm:$0xff] %vm1430_vm1, %v2691_v25  ;;  %2942 = vst.msk [vmem:[%s4138_s21 + $0xc0] sm:$0xff] %vm1430_vm1, %v2695_v26  ;;  %v3339_v27 = vpop.f32.mrb[6].mxu1  ;;  %2708 = vrot.lane.b32.xlu0 %v2691_v25, %s3761_s24 }
 0x21a   : > { %v2694_v28 = vadd.f32 %v3339_v27, %v3279_v8  ;;  %v2698_v29 = vsub.f32 %v3339_v27, %v3279_v8  ;;  %v2681_v30 = vpop.f32.mrb[7].mxu1 }
 0x21b   : > { %v2693_v31 = vadd.f32 %v2681_v30, %v2077_v7  ;;  %v2697_v32 = vsub.f32 %v2681_v30, %v2077_v7 }
 0x21c   : > { %2937 = vst.msk [vmem:[%s4138_s21 + $0x98] sm:$0xff] %vm1430_vm1, %v2694_v28  ;;  %2945 = vst.msk [vmem:[%s4138_s21 + $0xd8] sm:$0xff] %vm1430_vm1, %v2698_v29  ;;  %2736 = vrot.lane.b32.xlu1 %v2696_v22, %s3761_s24 }
 0x21d   : > { %2936 = vst.msk [vmem:[%s4138_s21 + $0x90] sm:$0xff] %vm1430_vm1, %v2693_v31  ;;  %2944 = vst.msk [vmem:[%s4138_s21 + $0xd0] sm:$0xff] %vm1430_vm1, %v2697_v32  ;;  %2734 = vrot.lane.b32.xlu0 %v2695_v26, %s3761_s24 }
 0x220   : > { %2714 = vrot.lane.b32.xlu1 %v2694_v28, %s3761_s24 }
 0x221   : > { %2712 = vrot.lane.b32.xlu0 %v2693_v31, %s3761_s24 }
 0x224   : > { %2740 = vrot.lane.b32.xlu1 %v2698_v29, %s3761_s24 }
 0x225   : > { %2738 = vrot.lane.b32.xlu0 %v2697_v32, %s3761_s24 }
 0x25a   : > { %v1442_v33 = vpop.permute.xlu1 %1441 }
 0x25b   : > { %2919 = vst.msk [vmem:[%s4138_s21 + $0x28] sm:$0xff] %vm1430_vm1, %v1442_v33  ;;  %v1440_v34 = vpop.permute.xlu0 %1439 }
 0x25c   : > { %2918 = vst.msk [vmem:[%s4138_s21 + $0x20] sm:$0xff] %vm1430_vm1, %v1440_v34 }
 0x25e   : > { %v1468_v35 = vpop.permute.xlu1 %1467 }
 0x25f   : > { %2927 = vst.msk [vmem:[%s4138_s21 + $0x68] sm:$0xff] %vm1430_vm1, %v1468_v35  ;;  %v1466_v36 = vpop.permute.xlu0 %1465 }
 0x260   : > { %2926 = vst.msk [vmem:[%s4138_s21 + $0x60] sm:$0xff] %vm1430_vm1, %v1466_v36 }
 0x262   : > { %v1446_v37 = vpop.permute.xlu1 %1445 }
 0x263   : > { %2921 = vst.msk [vmem:[%s4138_s21 + $0x38] sm:$0xff] %vm1430_vm1, %v1446_v37  ;;  %v1444_v38 = vpop.permute.xlu0 %1443 }
 0x264   : > { %2920 = vst.msk [vmem:[%s4138_s21 + $0x30] sm:$0xff] %vm1430_vm1, %v1444_v38 }
 0x266   : > { %v1472_v39 = vpop.permute.xlu1 %1471 }
 0x267   : > { %2929 = vst.msk [vmem:[%s4138_s21 + $0x78] sm:$0xff] %vm1430_vm1, %v1472_v39  ;;  %v1470_v40 = vpop.permute.xlu0 %1469 }
 0x268   : > { %2928 = vst.msk [vmem:[%s4138_s21 + $0x70] sm:$0xff] %vm1430_vm1, %v1470_v40 }
 0x28a   : > { %v2711_v41 = vpop.permute.xlu1 %2710 }
 0x28b   : > { %2939 = vst.msk [vmem:[%s4138_s21 + $0xa8] sm:$0xff] %vm1430_vm1, %v2711_v41  ;;  %v2709_v42 = vpop.permute.xlu0 %2708 }
 0x28c   : > { %2938 = vst.msk [vmem:[%s4138_s21 + $0xa0] sm:$0xff] %vm1430_vm1, %v2709_v42 }
 0x28e   : > { %v2737_v43 = vpop.permute.xlu1 %2736 }
 0x28f   : > { %2947 = vst.msk [vmem:[%s4138_s21 + $0xe8] sm:$0xff] %vm1430_vm1, %v2737_v43  ;;  %v2735_v44 = vpop.permute.xlu0 %2734 }
 0x290   : > { %2946 = vst.msk [vmem:[%s4138_s21 + $0xe0] sm:$0xff] %vm1430_vm1, %v2735_v44 }
 0x292   : > { %v2715_v48 = vpop.permute.xlu1 %2714 }
 0x293   : > { %2941 = vst.msk [vmem:[%s4138_s21 + $0xb8] sm:$0xff] %vm1430_vm1, %v2715_v48  ;;  %v2713_v49 = vpop.permute.xlu0 %2712 }
 0x294   : > { %2940 = vst.msk [vmem:[%s4138_s21 + $0xb0] sm:$0xff] %vm1430_vm1, %v2713_v49 }
 0x296   : > { %v2741_v50 = vpop.permute.xlu1 %2740 }
 0x297   : > { %2949 = vst.msk [vmem:[%s4138_s21 + $0xf8] sm:$0xff] %vm1430_vm1, %v2741_v50  ;;  %v2739_v51 = vpop.permute.xlu0 %2738 }
 0x298   : > { %2948 = vst.msk [vmem:[%s4138_s21 + $0xf0] sm:$0xff] %vm1430_vm1, %v2739_v51 }
 0x299   : > { %s2951_s26 = sshll.u32 %s3738_s12, 2  ;;  %s2952_s28 = sshll.u32 %s3742_s13, 7 }
 0x29a   : > { %s2766_s1 = sadd.s32 %s2952_s28, %s2951_s26  ;;  %s2785_s3 = sshll.u32 %s4138_s21, 4  ;;  %s2786_s3 = int_to_ptr.vmem [resolvable:$true] %s2785_s3 }
 0x29b   : > { %s2953_s30 = sshll.u32 %s2766_s1, 7  ;;  %s3762_s20 = smov 512  }
 0x29c   : > { %s2768_s6 = scalar_lea.hbm %s4271_s2, %s2953_s30  ;;  %3522 = sst [smem:[#allocation9]] (%p3892_p11), %s3762_s20 }
 0x29d   : > { %s3763_s17 = smov 2048   ;;  %s3764_s8 = smov 4  }
 0x29e   : > { %3523 = sst [smem:[#allocation9 + $0x1]] (%p3892_p11), %s3763_s17  ;;  %s3765_s12 = smov 128  }
 0x29f   : > { %3524 = sst [smem:[#allocation9 + $0x2]] (%p3892_p11), %s3764_s8  ;;  %s3766_s13 = smov 8  }
 0x2a0   : > { %3525 = sst [smem:[#allocation9 + $0x3]] (%p3892_p11), %s3765_s12  ;;  %s3767_s25 = smov [#allocation8]  }
 0x2a1   : > { %3526 = sst [smem:[#allocation9 + $0x4]] (%p3892_p11), %s3765_s12  ;;  %s3768_s14 = smov 0  }
 0x2a2   : > { %3527 = sst [smem:[#allocation9 + $0x5]] (%p3892_p11), %s3766_s13 }
 0x2a3   : > { %3528 = dma.general (%p3892_p11), %s2786_s3, 4096, %s2768_s6, %s2752_s18, %s3767_s25, [#allocation9], %s3768_s14, 0  }
 0x2a4 PF: > { %p3545_p6 = scmp.ge.s32.totalorder %s3754_s16, 2  ;;  %s2813_s27 = sand.u32 1, %s3726_s9  }
 0x2a5   : > { %p4301_p8 = scmp.ne.s32.totalorder %s4286_s22, 0  ;;  %s2814_s23 = scalar_lea.sflag [#allocation4], %s2813_s27 }
 0x2a7   : > { %p3539_p10 = pnand %p3545_p6, %p4301_p8 }
 0x2a9   : > { %3721 = dma.done.wait (!%p3539_p10), %s2814_s23, 4096  }
 0x2aa   : > { %3723 = vsyncadd (!%p3539_p10), %s2814_s23, 4294963200  ;;  %s19_s16 = sadd.s32 1, %s3754_s16   ;;  %s4302_s12 = sld [smem:[#allocation13_spill]] }
 0x2ab   : > { %p16_p12 = scmp.ge.s32.totalorder %s19_s16, 10   ;;  %s4303_s14 = sld [smem:[#allocation14_spill]] }
 0x2ac   : > { %s4304_s29 = sld [smem:[#allocation15_spill]]  ;;  %s4305_s9 = smov %s3730_s10 }
 0x2ad   : > { %s4306_s10 = smov %s3734_s11  ;;  %s4307_s11 = smov %s3909_s7 }
 0x2ae   : > { %s4308_s13 = smov %s3750_s15  ;;  %18 = sbr.rel (!%p16_p12) target bundleno = 10 (0xa), region = 90 }
 0x2b2   : > { %s4309_s15 = smov %s4304_s29 }
 0x2b5   :  { %2819 = vsyncpa [#allocation3], 1 }
 0x2b6   :  { %2821 = vsyncpa [#allocation3 + $0x1], 1 }
 0x2b7   :  { %2822 = vsyncpa [#allocation6], 1 }
 0x2b8   :  { %2823 = vsyncpa [#allocation4], 1 }
 0x2b9   :  { %2825 = vsyncpa [#allocation4 + $0x1], 1 }

</bundles_post_ra>
